<compile_context>
chip_gen: v7x
topology: tpu7x:2x2x1
jax: 0.10.0
libtpu: 0.0.40
codegen_flags: <defaults>
</compile_context>

<pallas_src>
import math
import jax
import jax.numpy as jnp
from jax import lax
from jax.experimental import pallas as pl
from jax.experimental.pallas import tpu as pltpu

EPS = 1e-12  # F.normalize eps

_VMEM_BUDGET = 48 * 1024 * 1024      # conservative: fits v7x 64 MiB physical
_DEFAULT_SCOPED = 32 * 1024 * 1024   # Mosaic default scoped-VMEM limit


def _round_up(x, m):
    return ((x + m - 1) // m) * m


def _vmem_limit(est_bytes):
    """Raise the scoped-VMEM limit only when the estimate needs it."""
    if est_bytes <= _DEFAULT_SCOPED:
        return None
    return int(min(est_bytes + 4 * 1024 * 1024, _VMEM_BUDGET))


def _k1_vmem_bytes(bt, mp, f, k):
    inp = 2 * bt * mp * f * 4                       # x block, dbl-buffered f32
    out = 2 * bt * k * f * 2                        # vlad block, dbl-buffered bf16
    wts = 2 * (f * k * 2 + k * 4 + k * f * 4)       # wc bf16, bc f32, w2t f32
    tmp = bt * mp * f * 4 + bt * mp * k * 4 + 2 * bt * k * f * 4  # live temps
    return inp + out + wts + tmp


def _pick_bt(b, mp, f, k):
    """Largest Bt dividing B that fits the VMEM budget, keeping >=2 grid steps
    (so the 'parallel' batch axis can shard across v7x's two TensorCores)."""
    cands = [bt for bt in range(1, b + 1) if b % bt == 0]
    two_step = [bt for bt in cands if b // bt >= 2]
    cands = two_step if two_step else [1]
    best = 1
    for bt in cands:
        if _k1_vmem_bytes(bt, mp, f, k) <= _VMEM_BUDGET:
            best = max(best, bt)
    return best


def _pick_tile(dim, max_tile):
    """Largest multiple-of-128 divisor of dim up to max_tile, else full dim."""
    best = None
    t = 128
    while t <= min(dim, max_tile):
        if dim % t == 0:
            best = t
        t += 128
    return best if best is not None else dim


def _k2_vmem_bytes(b, tk, td):
    return (2 * b * tk * 2) + (2 * tk * td * 2) + (2 * b * td * 4) + (2 * td * 4)


def _make_vlad_kernel(m_valid, m_pad):
    def vlad_kernel(x_ref, wc_ref, bc_ref, w2t_ref, o_ref):
        # x_ref: (Bt, Mp, F) f32   wc_ref: (F, K) bf16   bc_ref: (1, K) f32
        # w2t_ref: (K, F) f32      o_ref: (Bt, K, F) bf16  (lane-dense, K-major)
        Bt, Mp, F_dim = x_ref.shape
        K = wc_ref.shape[1]

        # Flatten to (Bt*Mp, F); Mp % 8 == 0 so this is a pure view.
        x2 = x_ref[...].reshape(Bt * Mp, F_dim)

        # F.normalize(x, p=2, dim=1) == x * rsqrt(max(||x||^2, eps^2)) (EUP).
        ss = jnp.sum(x2 * x2, axis=1, keepdims=True)
        xn = x2 * lax.rsqrt(jnp.maximum(ss, EPS * EPS))
        xn_bf = xn.astype(jnp.bfloat16)

        # Cluster assignment: bf16 MXU matmul, f32 accumulate, f32 softmax.
        act = jnp.dot(xn_bf, wc_ref[...], preferred_element_type=jnp.float32)
        act = act + bc_ref[...]
        act = act - jnp.max(act, axis=1, keepdims=True)
        e = jnp.exp(act)
        act = e * pl.reciprocal(jnp.sum(e, axis=1, keepdims=True), approx=True)

        act3 = act.reshape(Bt, Mp, K)
        if m_pad != m_valid:
            # Zero assignments of zero-padded samples (their xn rows are 0
            # already, but a_sum must not include their softmax).
            m_ids = lax.broadcasted_iota(jnp.int32, (Bt, Mp, K), 1)
            act3 = jnp.where(m_ids < m_valid, act3, 0.0)

        # Residual anchor in K-major layout: a[b,k,f] = a_sum[b,k] * w2[f,k].
        a_sum = jnp.sum(act3, axis=1)                        # (Bt, K)
        a = a_sum[:, :, None] * w2t_ref[...][None, :, :]     # (Bt, K, F)

        # vlad[b,k,f] = sum_m act[b,m,k] * xn[b,m,f] -- one batched MXU call,
        # F (lane-dense) output width.
        xn3_bf = xn_bf.reshape(Bt, Mp, F_dim)
        act3_bf = act3.astype(jnp.bfloat16)
        vlad = lax.dot_general(
            act3_bf, xn3_bf, (((1,), (1,)), ((0,), (0,))),
            preferred_element_type=jnp.float32,
        )                                                    # (Bt, K, F)
        vlad = vlad - a

        # Fused intra-norm (over F, axis=-1) + global norm:
        #   g2 = sum_k cn_k / max(cn_k, eps^2)  (== ||intra-normalized vlad||^2)
        #   scale = rsqrt(max(cn, eps^2)) * rsqrt(max(g2, eps^2))
        cn = jnp.sum(vlad * vlad, axis=2, keepdims=True)     # (Bt, K, 1)
        cn_c = jnp.maximum(cn, EPS * EPS)
        g2 = jnp.sum(cn / cn_c, axis=1, keepdims=True)       # (Bt, 1, 1)
        scale = lax.rsqrt(cn_c) * lax.rsqrt(jnp.maximum(g2, EPS * EPS))
        o_ref[...] = (vlad * scale).astype(o_ref.dtype)

    return vlad_kernel


def hidden1_kernel(v_ref, w_ref, b_ref, o_ref):
    # v_ref: (B, tk) bf16   w_ref: (tk, td) bf16   b_ref: (1, td) f32
    # o_ref: (B, td) f32 -- resident across the reduction axis (axis 1).
    kidx = pl.program_id(1)

    @pl.when(kidx == 0)
    def _():
        o_ref[...] = jnp.zeros_like(o_ref) + b_ref[...]

    o_ref[...] += jnp.dot(v_ref[...], w_ref[...], preferred_element_type=jnp.float32)


def netvlad_forward(x, params, max_samples):
    """x: (batch*max_samples, feature_size) float32 -> (batch, output_dim)."""
    BM, F_dim = x.shape
    M = max_samples
    B = BM // M
    K = params["cluster_weights"].shape[1]
    D = params["hidden1_weights"].shape[1]

    # Pad M to a multiple of 8 so in-kernel reshapes are pure views.
    Mp = _round_up(M, 8)
    x3 = x.reshape(B, M, F_dim)
    if Mp != M:
        x3 = jnp.pad(x3, ((0, 0), (0, Mp - M), (0, 0)))

    wc = params["cluster_weights"].astype(jnp.bfloat16)          # (F, K) MXU rhs
    bc = params["cluster_biases"].reshape(1, K).astype(jnp.float32)
    w2t = params["cluster_weights2"].reshape(F_dim, K).T         # (K, F) f32
    # hidden1 weights: permute rows f*K+k -> k*F+f to match the K-major
    # descriptor flatten; cast to bf16 for the memory-bound weight stream.
    wh = (
        params["hidden1_weights"]
        .reshape(F_dim, K, D)
        .transpose(1, 0, 2)
        .reshape(K * F_dim, D)
        .astype(jnp.bfloat16)
    )
    bh = params["hidden1_biases"].reshape(1, D).astype(jnp.float32)

    Bt = _pick_bt(B, Mp, F_dim, K)

    # ---- Kernel 1: normalized VLAD descriptors, (B, K, F) lane-dense bf16 ----
    vlad = pl.pallas_call(
        _make_vlad_kernel(M, Mp),
        out_shape=jax.ShapeDtypeStruct((B, K, F_dim), jnp.bfloat16),
        grid_spec=pltpu.PrefetchScalarGridSpec(
            num_scalar_prefetch=0,
            grid=(B // Bt,),
            in_specs=[
                pl.BlockSpec((Bt, Mp, F_dim), lambda b: (b, 0, 0)),
                pl.BlockSpec((F_dim, K), lambda b: (0, 0)),
                pl.BlockSpec((1, K), lambda b: (0, 0)),
                pl.BlockSpec((K, F_dim), lambda b: (0, 0)),
            ],
            out_specs=pl.BlockSpec((Bt, K, F_dim), lambda b: (b, 0, 0)),
        ),
        compiler_params=pltpu.CompilerParams(
            dimension_semantics=("parallel",),
            vmem_limit_bytes=_vmem_limit(_k1_vmem_bytes(Bt, Mp, F_dim, K)),
        ),
    )(x3, wc, bc, w2t)

    # Flatten (B, K, F) -> (B, K*F); row index k*F+f matches the permuted wh.
    vlad2 = vlad.reshape(B, K * F_dim)

    # ---- Kernel 2: tiled (B, K*F) @ (K*F, D) matmul + bias, D parallel ----
    KF = K * F_dim
    tk = _pick_tile(KF, 2048)
    td = _pick_tile(D, 512)
    out = pl.pallas_call(
        hidden1_kernel,
        out_shape=jax.ShapeDtypeStruct((B, D), jnp.float32),
        grid_spec=pltpu.PrefetchScalarGridSpec(
            num_scalar_prefetch=0,
            grid=(D // td, KF // tk),
            in_specs=[
                pl.BlockSpec((B, tk), lambda d, k: (0, k)),
                pl.BlockSpec((tk, td), lambda d, k: (k, d)),
                pl.BlockSpec((1, td), lambda d, k: (0, d)),
            ],
            out_specs=pl.BlockSpec((B, td), lambda d, k: (0, d)),
        ),
        compiler_params=pltpu.CompilerParams(
            dimension_semantics=("parallel", "arbitrary"),
            vmem_limit_bytes=_vmem_limit(_k2_vmem_bytes(B, tk, td)),
        ),
    )(vlad2, wh, bh)
    return out


def netvlad_ref(x, params, max_samples):
    """Pure-JAX reference mirroring the PyTorch forward exactly (f32)."""
    M = max_samples
    F_dim = x.shape[1]
    K = params["cluster_weights"].shape[1]
    xn = x / jnp.maximum(jnp.linalg.norm(x, axis=1, keepdims=True), EPS)
    act = xn @ params["cluster_weights"] + params["cluster_biases"]
    act = jax.nn.softmax(act, axis=1)
    act = act.reshape(-1, M, K)
    a_sum = jnp.sum(act, axis=-2, keepdims=True)             # (B, 1, K)
    a = a_sum * params["cluster_weights2"]                   # (B, F, K)
    act_t = jnp.transpose(act, (0, 2, 1))                    # (B, K, M)
    xr = xn.reshape(-1, M, F_dim)                            # (B, M, F)
    vlad = jnp.matmul(act_t, xr)                             # (B, K, F)
    vlad = jnp.transpose(vlad, (0, 2, 1))                    # (B, F, K)
    vlad = vlad - a
    vlad = vlad / jnp.maximum(jnp.linalg.norm(vlad, axis=1, keepdims=True), EPS)
    vlad = vlad.reshape(-1, K * F_dim)
    vlad = vlad / jnp.maximum(jnp.linalg.norm(vlad, axis=1, keepdims=True), EPS)
    return vlad @ params["hidden1_weights"] + params["hidden1_biases"]


def init_params(key, feature_size, cluster_size, output_dim):
    k1, k2, k3, k4 = jax.random.split(key, 4)
    std_f = 1.0 / math.sqrt(feature_size)
    std_c = 1.0 / math.sqrt(cluster_size)
    return {
        "cluster_weights": std_f
        * jax.random.normal(k1, (feature_size, cluster_size), jnp.float32),
        "cluster_biases": std_f
        * jax.random.normal(k2, (cluster_size,), jnp.float32),
        "cluster_weights2": std_f
        * jax.random.normal(k3, (1, feature_size, cluster_size), jnp.float32),
        "hidden1_weights": std_c
        * jax.random.normal(
            k4, (cluster_size * feature_size, output_dim), jnp.float32
        ),
        "hidden1_biases": jnp.full((output_dim,), 0.1, jnp.float32),
        # TODO(synk): gating_weights/biases/bn and cluster_bn are never used in
        # the module's forward() (gating not called, add_batch_norm=False), so
        # they are intentionally not materialized.
    }


if __name__ == "__main__":
    B, M, F_dim, K, D = 2, 8, 16, 8, 16  # batch, max_samples, feature, clusters, out

    key = jax.random.PRNGKey(0)
    kx, kp = jax.random.split(key)
    x = jax.random.normal(kx, (B * M, F_dim), jnp.float32)
    params = init_params(kp, F_dim, K, D)

    out = netvlad_forward(x, params, M)
    out = jax.block_until_ready(out)

    ref = netvlad_ref(x, params, M)
    assert out.shape == (B, D)
    err = float(jnp.max(jnp.abs(out - ref)))
    # bf16 MXU operands / bf16 descriptor -> ~1e-2-scale tolerance.
    assert jnp.allclose(out, ref, atol=2e-2, rtol=2e-2), (
        "mismatch vs reference: max abs err = %g" % err
    )
    print("KERNEL_OK")
</pallas_src>

<mosaic_0001>
module attributes {stable_mosaic.version = 11 : i64} {
  func.func @vlad_kernel(%arg0: i32, %arg1: memref<1x8x16xf32, #tpu.memory_space<vmem>>, %arg2: memref<16x8xbf16, #tpu.memory_space<vmem>>, %arg3: memref<1x8xf32, #tpu.memory_space<vmem>>, %arg4: memref<8x16xf32, #tpu.memory_space<vmem>>, %arg5: memref<1x8x16xbf16, #tpu.memory_space<vmem>>) attributes {dimension_semantics = [#tpu.dimension_semantics<parallel>], iteration_bounds = array<i64: 2>, scalar_prefetch = 0 : i64, scratch_operands = 0 : i64, tpu.core_type = #tpu.core_type<tc>, window_params = [{transform_indices = @transform_0, window_bounds = array<i64: 1, 8, 16>}, {pipeline_mode = #tpu.pipeline_mode<synchronous>, transform_indices = @transform_1, window_bounds = array<i64: 16, 8>}, {pipeline_mode = #tpu.pipeline_mode<synchronous>, transform_indices = @transform_2, window_bounds = array<i64: 1, 8>}, {pipeline_mode = #tpu.pipeline_mode<synchronous>, transform_indices = @transform_3, window_bounds = array<i64: 8, 16>}, {transform_indices = @transform_4, window_bounds = array<i64: 1, 8, 16>}]} {
    %c0 = arith.constant 0 : index
    %c0_0 = arith.constant 0 : index
    %c0_1 = arith.constant 0 : index
    %0 = vector.load %arg1[%c0, %c0_0, %c0_1] : memref<1x8x16xf32, #tpu.memory_space<vmem>>, vector<1x8x16xf32>
    %1 = vector.shape_cast %0 : vector<1x8x16xf32> to vector<8x16xf32>
    %2 = arith.mulf %1, %1 : vector<8x16xf32>
    %cst = arith.constant dense<0.000000e+00> : vector<8xf32>
    %3 = vector.multi_reduction <add>, %2, %cst [1] : vector<8x16xf32> to vector<8xf32>
    %4 = vector.shape_cast %3 : vector<8xf32> to vector<8x1xf32>
    %cst_2 = arith.constant 1.000000e-24 : f32
    %5 = vector.broadcast %cst_2 : f32 to vector<8x1xf32>
    %6 = arith.maximumf %4, %5 : vector<8x1xf32>
    %7 = math.rsqrt %6 : vector<8x1xf32>
    %8 = vector.broadcast %7 : vector<8x1xf32> to vector<8x16xf32>
    %9 = arith.mulf %1, %8 : vector<8x16xf32>
    %10 = arith.truncf %9 : vector<8x16xf32> to vector<8x16xbf16>
    %c0_3 = arith.constant 0 : index
    %c0_4 = arith.constant 0 : index
    %11 = vector.load %arg2[%c0_3, %c0_4] : memref<16x8xbf16, #tpu.memory_space<vmem>>, vector<16x8xbf16>
    %cst_5 = arith.constant dense<0.000000e+00> : vector<8x8xf32>
    %12 = tpu.matmul %10, %11, %cst_5 {dimension_numbers = #tpu.dot_dimension_numbers<[1], [0], [0], [1], [0, 0, 1, 1], [], []>} : vector<8x16xbf16>, vector<16x8xbf16>, vector<8x8xf32> -> vector<8x8xf32>
    %c0_6 = arith.constant 0 : index
    %c0_7 = arith.constant 0 : index
    %13 = vector.load %arg3[%c0_6, %c0_7] : memref<1x8xf32, #tpu.memory_space<vmem>>, vector<1x8xf32>
    %14 = vector.broadcast %13 : vector<1x8xf32> to vector<8x8xf32>
    %15 = arith.addf %12, %14 : vector<8x8xf32>
    %cst_8 = arith.constant dense<0xFF800000> : vector<8xf32>
    %16 = vector.multi_reduction <maximumf>, %15, %cst_8 [1] : vector<8x8xf32> to vector<8xf32>
    %17 = vector.shape_cast %16 : vector<8xf32> to vector<8x1xf32>
    %18 = vector.broadcast %17 : vector<8x1xf32> to vector<8x8xf32>
    %19 = arith.subf %15, %18 : vector<8x8xf32>
    %20 = math.exp %19 : vector<8x8xf32>
    %cst_9 = arith.constant dense<0.000000e+00> : vector<8xf32>
    %21 = vector.multi_reduction <add>, %20, %cst_9 [1] : vector<8x8xf32> to vector<8xf32>
    %22 = vector.shape_cast %21 : vector<8xf32> to vector<8x1xf32>
    %23 = tpu.reciprocal %22 {approx = true} : vector<8x1xf32> -> vector<8x1xf32>
    %24 = vector.broadcast %23 : vector<8x1xf32> to vector<8x8xf32>
    %25 = arith.mulf %20, %24 : vector<8x8xf32>
    %26 = vector.shape_cast %25 : vector<8x8xf32> to vector<1x8x8xf32>
    %cst_10 = arith.constant dense<0.000000e+00> : vector<1x8xf32>
    %27 = vector.multi_reduction <add>, %26, %cst_10 [1] : vector<1x8x8xf32> to vector<1x8xf32>
    %28 = vector.shape_cast %27 : vector<1x8xf32> to vector<1x8x1xf32>
    %c0_11 = arith.constant 0 : index
    %c0_12 = arith.constant 0 : index
    %29 = vector.load %arg4[%c0_11, %c0_12] : memref<8x16xf32, #tpu.memory_space<vmem>>, vector<8x16xf32>
    %30 = vector.shape_cast %29 : vector<8x16xf32> to vector<1x8x16xf32>
    %31 = vector.broadcast %28 : vector<1x8x1xf32> to vector<1x8x16xf32>
    %32 = arith.mulf %31, %30 : vector<1x8x16xf32>
    %33 = vector.shape_cast %10 : vector<8x16xbf16> to vector<1x8x16xbf16>
    %34 = arith.truncf %26 : vector<1x8x8xf32> to vector<1x8x8xbf16>
    %cst_13 = arith.constant dense<0.000000e+00> : vector<1x8x16xf32>
    %35 = tpu.matmul %34, %33, %cst_13 {dimension_numbers = #tpu.dot_dimension_numbers<[1], [1], [2], [2], [0, 0, 0, 2, 1, 2], [0], [0]>} : vector<1x8x8xbf16>, vector<1x8x16xbf16>, vector<1x8x16xf32> -> vector<1x8x16xf32>
    %36 = arith.subf %35, %32 : vector<1x8x16xf32>
    %37 = arith.mulf %36, %36 : vector<1x8x16xf32>
    %cst_14 = arith.constant dense<0.000000e+00> : vector<1x8xf32>
    %38 = vector.multi_reduction <add>, %37, %cst_14 [2] : vector<1x8x16xf32> to vector<1x8xf32>
    %39 = vector.shape_cast %38 : vector<1x8xf32> to vector<1x8x1xf32>
    %cst_15 = arith.constant 1.000000e-24 : f32
    %40 = vector.broadcast %cst_15 : f32 to vector<1x8x1xf32>
    %41 = arith.maximumf %39, %40 : vector<1x8x1xf32>
    %42 = arith.divf %39, %41 : vector<1x8x1xf32>
    %cst_16 = arith.constant dense<0.000000e+00> : vector<1x1xf32>
    %43 = vector.multi_reduction <add>, %42, %cst_16 [1] : vector<1x8x1xf32> to vector<1x1xf32>
    %44 = vector.shape_cast %43 : vector<1x1xf32> to vector<1x1x1xf32>
    %45 = math.rsqrt %41 : vector<1x8x1xf32>
    %cst_17 = arith.constant 1.000000e-24 : f32
    %46 = vector.broadcast %cst_17 : f32 to vector<1x1x1xf32>
    %47 = arith.maximumf %44, %46 : vector<1x1x1xf32>
    %48 = math.rsqrt %47 : vector<1x1x1xf32>
    %49 = vector.broadcast %48 : vector<1x1x1xf32> to vector<1x8x1xf32>
    %50 = arith.mulf %45, %49 : vector<1x8x1xf32>
    %51 = vector.broadcast %50 : vector<1x8x1xf32> to vector<1x8x16xf32>
    %52 = arith.mulf %36, %51 : vector<1x8x16xf32>
    %53 = arith.truncf %52 : vector<1x8x16xf32> to vector<1x8x16xbf16>
    %c0_18 = arith.constant 0 : index
    %c0_19 = arith.constant 0 : index
    %c0_20 = arith.constant 0 : index
    %54 = vector.load %arg5[%c0_18, %c0_19, %c0_20] : memref<1x8x16xbf16, #tpu.memory_space<vmem>>, vector<1x8x16xbf16>
    tpu.vector_store %arg5[%c0_18, %c0_19, %c0_20], %53 {strides = array<i32>} : memref<1x8x16xbf16, #tpu.memory_space<vmem>>, vector<1x8x16xbf16>,
    return
  }
  func.func @transform_0(%arg0: i32) -> (i32, i32, i32) {
    %c0_i32 = arith.constant 0 : i32
    %c0_i32_0 = arith.constant 0 : i32
    %c0_i32_1 = arith.constant 0 : i32
    return %arg0, %c0_i32, %c0_i32_0 : i32, i32, i32
  }
  func.func @transform_1(%arg0: i32) -> (i32, i32) {
    %c0_i32 = arith.constant 0 : i32
    %c0_i32_0 = arith.constant 0 : i32
    %c0_i32_1 = arith.constant 0 : i32
    return %c0_i32, %c0_i32_0 : i32, i32
  }
  func.func @transform_2(%arg0: i32) -> (i32, i32) {
    %c0_i32 = arith.constant 0 : i32
    %c0_i32_0 = arith.constant 0 : i32
    %c0_i32_1 = arith.constant 0 : i32
    return %c0_i32, %c0_i32_0 : i32, i32
  }
  func.func @transform_3(%arg0: i32) -> (i32, i32) {
    %c0_i32 = arith.constant 0 : i32
    %c0_i32_0 = arith.constant 0 : i32
    %c0_i32_1 = arith.constant 0 : i32
    return %c0_i32, %c0_i32_0 : i32, i32
  }
  func.func @transform_4(%arg0: i32) -> (i32, i32, i32) {
    %c0_i32 = arith.constant 0 : i32
    %c0_i32_0 = arith.constant 0 : i32
    %c0_i32_1 = arith.constant 0 : i32
    return %arg0, %c0_i32, %c0_i32_0 : i32, i32, i32
  }
}

</mosaic_0001>

<bundles_post_ra>
// kernel: tpu_custom_call.1
= control target key start
LH: loop header
LB: loop body
LE: loop exit
PB: predicated region body
PF: predicated region fallthrough
CT: control target
= control target key end

     0   :  { %9 = vsyncpa [#allocation3], 0  ;;  %s874_s0 = inlined_call_operand.hbm [shape: f32[2,8,16], index: 0, kind: input, shape index: {}]   ;;  %s875_s1 = inlined_call_operand.vmem [shape: bf16[16,8], index: 1, kind: input, shape index: {}]   ;;  %s876_s2 = inlined_call_operand.vmem [shape: f32[1,8], index: 2, kind: input, shape index: {}]   ;;  %s877_s3 = inlined_call_operand.vmem [shape: f32[8,16], index: 3, kind: input, shape index: {}]   ;;  %s878_s4 = inlined_call_operand.hbm [shape: bf16[2,8,16], index: 4, kind: output, shape index: {}]  }
   0x1   :  { %11 = vsyncpa [#allocation3 + $0x1], 0 }
   0x2   :  { %12 = vsyncpa [#allocation4], 0 }
   0x3   :  { %14 = vsyncpa [#allocation4 + $0x1], 0  ;;  %s696_s15 = smov 0   ;;  %s698_s16 = smov 0  }
   0x4   :  { %s700_s17 = smov 0   ;;  %s702_s18 = smov 0  }
   0x5 LB: > { %s717_s19 = sadd.s32 4294967295, %s665_s18   ;;  %s475_s20 = sadd.s32 4294967294, %s665_s18   ;;  %s665_s18 = sphi %s702_s18, %s893_s18   ;;  %s661_s17 = sphi %s700_s17, %s892_s17   ;;  %s657_s16 = sphi %s698_s16, %s891_s16   ;;  %s653_s15 = sphi %s696_s15, %s890_s15  }
   0x6   : > { %s721_s21 = sadd.s32 1, %s665_s18   ;;  %s27_s22 = sadd.s32 1, %s661_s17 }
   0x7   : > { %s24_s23 = ssub.s32 %s665_s18, %s721_s21  ;;  %p34_p0 = scmp.ne.s32.totalorder %s661_s17, %s657_s16 }
   0x8   : > { %p25_p1 = scmp.eq.s32.totalorder %s24_s23, 0  ;;  %p35_p2 = scmp.eq.s32.totalorder %s665_s18, 0 }
   0x9   : > { %p40_p3 = scmp.ne.s32.totalorder %s657_s16, %s653_s15  ;;  %p41_p4 = scmp.eq.s32.totalorder %s717_s19, 0 }
   0xa   : > { %s733_s24 = scalar_select %p25_p1, %s661_s17, %s27_s22  }
   0xb   : > { %p735_p5 = por %p35_p2, %p34_p0  ;;  %p739_p6 = por %p41_p4, %p40_p3 }
   0xc   : > { %p127_p7 = scmp.eq.s32.totalorder %s717_s19, 1  ;;  %p133_p8 = scmp.eq.s32.totalorder %s475_s20, 1 }
   0xd   : > { %p519_p10 = scmp.lt.s32.totalorder %s665_s18, 2  ;;  %s162_s29 = sand.u32 1, %s661_s17  }
   0xe   : > { %p746_p11 = por %p127_p7, %p34_p0  ;;  %p750_p12 = por %p133_p8, %p40_p3 }
   0xf   : > { %s479_s30 = sshll.u32 %s665_s18, 7  ;;  %s478_s5 = sshll.u32 %s162_s29, 3 }
  0x10   : > { %s882_s27 = scalar_select %p746_p11, 1, 0 }
  0x11   : > { %s883_s28 = scalar_select %p750_p12, 1, 0 }
  0x12   : > { %s759_s8 = scalar_lea.hbm %s874_s0, %s479_s30  ;;  %s166_s9 = scalar_lea.vmem [#allocation2], %s478_s5 }
  0x13   : > { %s173_s10 = sshll.u32 %s166_s9, 4  ;;  %p763_p13 = pnand %p519_p10, %p735_p5  ;;  %s767_s10 = int_to_ptr.vmem [resolvable:$true] %s173_s10 }
  0x14   : > { %s163_s12 = scalar_lea.sflag [#allocation3], %s162_s29  ;;  %s569_s13 = scalar_lea.hbm %s759_s8, 128 }
  0x15   : > { %p570_p2 = scmp.ne.s32.totalorder %s759_s8, %s569_s13  ;;  %p571_p3 = pneg %p763_p13 }
  0x16   : > { %s574_s22 = scalar_lea.hbm %s874_s0, 256  ;;  %p575_p5 = scmp.lt.u32.totalorder %s759_s8, %s874_s0 }
  0x17   : > { %p572_p4 = pnand %p571_p3, %p570_p2  ;;  %p576_p8 = scmp.lt.u32.totalorder %s574_s22, %s569_s13 }
  0x18   : > { %p578_p9 = scmp.lt.u32.totalorder %s569_s13, %s759_s8 }
  0x19   : > { %p573_p7 = pneg %p572_p4  ;;  %p577_p10 = por %p576_p8, %p575_p5 }
  0x1b   : > { %p579_p0 = por %p578_p9, %p577_p10 }
  0x1d   : > { %p580_p1 = pnand %p579_p0, %p573_p7 }
  0x1f   : > { %583 = shalt.err (!%p580_p1)
}
  0x20   : > { %s584_s29 = scalar_lea.vmem %s767_s10, 128  ;;  %s667_s30 = smov [#allocation2]  }
  0x21   : > { %p585_p2 = scmp.ne.s32.totalorder %s767_s10, %s584_s29  ;;  %s589_s5 = sshll.u32 %s667_s30, 4  ;;  %s590_s5 = int_to_ptr.vmem [resolvable:$false] %s589_s5 }
  0x22   : > { %s591_s6 = scalar_lea.vmem %s590_s5, 256  ;;  %p592_p11 = scmp.lt.s32.totalorder %s767_s10, %s590_s5 }
  0x23   : > { %p587_p4 = pnand %p585_p2, %p571_p3  ;;  %p593_p5 = scmp.lt.s32.totalorder %s591_s6, %s584_s29 }
  0x25   : > { %p588_p12 = pneg %p587_p4  ;;  %p594_p8 = por %p593_p5, %p592_p11 }
  0x27   : > { %p595_p9 = pnand %p594_p8, %p588_p12 }
  0x29   : > { %598 = shalt.err (!%p595_p9)
}
  0x2a   : > { %514 = dma.hbm_to_vmem [thread:$0]  (!%p763_p13), %s759_s8, 128, %s767_s10, %s163_s12  }
  0x2b   : > { %p885_p0 = scmp.lt.s32.totalorder %s665_s18, 3  ;;  %p886_p1 = scmp.ge.s32.totalorder %s665_s18, 1 }
  0x2d   : > { %p179_p3 = pnand %p886_p1, %p885_p0 }
  0x2e   : > { %s801_s7 = sand.u32 (!%p179_p3), 1, %s657_s16  }
  0x2f   : > { %182 = sbr.rel (%p179_p3) target bundleno = 1270 (0x4f6), region = 36  ;;  %s481_s9 = sshll.u32 (!%p179_p3), %s801_s7, 3 }
  0x30   : > { %s185_s13 = scalar_lea.sflag (!%p179_p3), [#allocation3], %s801_s7  ;;  %s188_s14 = scalar_lea.vmem (!%p179_p3), [#allocation2], %s481_s9 }
  0x36   : > { %644 = dma.done.wait (%p739_p6), %s185_s13, 128  }
  0x37   : > { %646 = vsyncadd (%p739_p6), %s185_s13, 4294967168  ;;  %v214_v0 = vld [vmem:[%s188_s14] sm:$0xff]  ;;  %vm216_vm0 = vcmask 130048   ;;  %v668_v4 = vmov 0.0   ;;  %vm669_vm1 = vmmov 0   ;;  %vm326_vm2 = vcmask 1043456  }
  0x38   : > { %v215_v1 = vmul.f32 %v214_v0, %v214_v0  ;;  %v556_v3 = vld [vmem:[%s875_s1] sm:$0xff]   ;;  %495 = vmatprep.subr.bf16.mxu0 %v668_v4  ;;  %497 = vmatprep.mubr.msk.bf16.mxu0 %vm669_vm1, %v668_v4  ;;  %vm282_vm3 = vcmask 64512   ;;  %s482_s22 = sshll.u32 %s801_s7, 2  ;;  %s488_s23 = sshll.u32 %s717_s19, 6  ;;  %vm389_vm4 = vcmask 125952  }
  0x39   : > { %496 = vmatpush3.bf16.msra.mxu0 %v556_v3  ;;  %501 = vmatprep.subr.bf16.mxu1 %v668_v4  ;;  %v483_v11 = vld [vmem:[%s876_s2] ss:$0 sm:$0xff]  ;;  %s212_s25 = scalar_lea.vmem [#allocation5], %s482_s22  ;;  %s830_s6 = scalar_lea.hbm %s878_s4, %s488_s23 }
  0x3a   : > { %v217_v2 = vsel %vm216_vm0, %v215_v1, 0.0  ;;  %503 = vmatprep.mubr.msk.bf16.mxu1 %vm669_vm1, %v668_v4  ;;  %v304_v35 = vld [vmem:[%s877_s3] sm:$0xff]  ;;  %s405_s29 = sshll.u32 %s212_s25, 4  ;;  %s392_s9 = scalar_lea.sflag [#allocation4], %s801_s7  ;;  %s832_s29 = int_to_ptr.vmem [resolvable:$true] %s405_s29 }
  0x3b   : > { %218 = vadd.xlane.f32.xlu0 %v217_v2  ;;  %s599_s13 = scalar_lea.vmem %s832_s29, 64  ;;  %p887_p11 = scmp.ne.s32.totalorder %s882_s27, 0 }
  0x3c   : > { %p600_p6 = scmp.ne.s32.totalorder %s832_s29, %s599_s13  ;;  %s670_s19 = smov [#allocation5]  }
  0x3d   : > { %s603_s14 = sshll.u32 %s670_s19, 4  ;;  %s604_s14 = int_to_ptr.vmem [resolvable:$false] %s603_s14 }
  0x3e   : > { %p601_p12 = pnand %p600_p6, %p887_p11  ;;  %s605_s8 = scalar_lea.vmem %s604_s14, 128 }
  0x3f   : > { %p606_p7 = scmp.lt.s32.totalorder %s832_s29, %s604_s14  ;;  %p607_p10 = scmp.lt.s32.totalorder %s605_s8, %s599_s13 }
  0x40   : > { %p602_p13 = pneg %p601_p12 }
  0x41   : > { %p608_p2 = por %p607_p10, %p606_p7 }
  0x43   : > { %p609_p4 = pnand %p608_p2, %p602_p13 }
  0xc8   : > { %v219_v5 = vpop.xlane.xlu0 %218 }
  0xc9   : > { %v220_v6 = vmax.f32 %v219_v5, 1e-24 }
  0xcb   : > { %557 = vrsqrt.f32 %v220_v6 }
  0xd5   : > { %v558_v7 = vpop.eup %557 }
  0xd6   : > { %v222_v8 = vmul.f32 %v558_v7, %v214_v0 }
  0xd8   : > { %v223_v9 = vpack.c.bf16 %v222_v8, %v222_v8 }
  0xda   : > { %498 = vmatmul.mubr.msk.bf16.vlgmr.msra.gmra.mrb[0].mxu0 %vm216_vm0, %v223_v9  ;;  %v327_v10 = vsel %vm326_vm2, %v223_v9, 0 }
  0xdb   : > { %502 = vmatpush3.bf16.msra.mxu1 %v327_v10 }
 0x1ad   : > { %v276_v12 = vpop.f32.mrb[0].mxu0 }
 0x1ae   : > { %v277_v13 = vadd.f32 %v483_v11, %v276_v12  ;;  %v499_v14 = vpop.f32.mrb[1].mxu0 }
 0x1af   : > { %v279_v15 = vpop.f32.mrb[2].mxu0 }
 0x1b0   : > { %v500_v16 = vpop.f32.mrb[3].mxu0  ;;  %v283_v17 = vsel %vm282_vm3, %v277_v13, -inf }
 0x1b1   : > { %284 = vmax.xlane.f32.xlu0 %v283_v17 }
 0x23e   : > { %v285_v18 = vpop.xlane.xlu0 %284 }
 0x23f   : > { %v286_v19 = vsub.f32 %v277_v13, %v285_v18 }
 0x241   : > { %v287_v20 = vmul.f32 1.442695, %v286_v19 }
 0x243   : > { %559 = vpow2.f32 %v287_v20 }
 0x24d   : > { %v560_v21 = vpop.eup %559 }
 0x24e   : > { %v289_v22 = vsel %vm282_vm3, %v560_v21, 0.0 }
 0x24f   : > { %290 = vadd.xlane.f32.xlu1 %v289_v22 }
 0x2dc   : > { %v291_v23 = vpop.xlane.xlu1 %290 }
 0x2dd   : > { %561 = vrcp.f32 %v291_v23 }
 0x2e7   : > { %v562_v24 = vpop.eup %561 }
 0x2e8   : > { %v293_v25 = vmul.f32 %v562_v24, %v560_v21 }
 0x2ea   : > { %v306_v26 = vpack.c.bf16 %v293_v25, %v293_v25  ;;  %v294_v27 = vsel %vm282_vm3, %v293_v25, 0.0 }
 0x2eb   : > { %v295_v28 = vrot.slane %v294_v27, 4 }
 0x2ec   : > { %307 = vxpose.xlu1.c.b16.start.end [1/1] (short) (narrow) %v306_v26, 16 }
 0x2ed   : > { %v296_v29 = vadd.f32 %v295_v28, %v294_v27 }
 0x2ef   : > { %v297_v30 = vrot.slane %v296_v29, 2 }
 0x2f1   : > { %v298_v31 = vadd.f32 %v297_v30, %v296_v29 }
 0x2f3   : > { %v299_v32 = vrot.slane %v298_v31, 1 }
 0x2f5   : > { %v300_v33 = vadd.f32 %v299_v32, %v298_v31 }
 0x2f7   : > { %302 = vbcast.lane.b32.xlu0 %v300_v33, 256 }
 0x352   : > { %v315_v34 = vpop.trf.xlu1 }
 0x353   : > { %504 = vmatmul.mubr.msk.bf16.vlgmr.msra.gmra.mrb[0].mxu1 %vm282_vm3, %v315_v34 }
 0x369   : > { %v303_v36 = vpop.permute.xlu0 %302 }
 0x36a   : > { %v305_v37 = vmul.f32 %v304_v35, %v303_v36 }
 0x426   : > { %v363_v38 = vpop.f32.mrb[0].mxu1 }
 0x427   : > { %v369_v39 = vsub.f32 %v363_v38, %v305_v37  ;;  %v505_v40 = vpop.f32.mrb[1].mxu1 }
 0x428   : > { %v366_v41 = vpop.f32.mrb[2].mxu1 }
 0x429   : > { %v506_v42 = vpop.f32.mrb[3].mxu1  ;;  %v370_v43 = vmul.f32 %v369_v39, %v369_v39 }
 0x42b   : > { %v371_v44 = vsel %vm216_vm0, %v370_v43, 0.0 }
 0x42c   : > { %372 = vadd.xlane.f32.xlu0 %v371_v44 }
 0x4b9   : > { %v373_v45 = vpop.xlane.xlu0 %372 }
 0x4ba   : > { %v374_v46 = vmax.f32 %v373_v45, 1e-24 }
 0x4bc   : > { %563 = vrcp.f32 %v374_v46 }
 0x4bd   : > { %565 = vrsqrt.f32 %v374_v46 }
 0x4c6   : > { %v564_v47 = vpop.eup %563 }
 0x4c7   : > { %v376_v48 = vmul.f32 %v564_v47, %v373_v45  ;;  %v566_v56 = vpop.eup %565 }
 0x4c9   : > { %v377_v49 = vrot.slane %v376_v48, 4 }
 0x4cb   : > { %v378_v50 = vadd.f32 %v377_v49, %v376_v48 }
 0x4cd   : > { %v379_v51 = vrot.slane %v378_v50, 2 }
 0x4cf   : > { %v380_v52 = vadd.f32 %v379_v51, %v378_v50 }
 0x4d1   : > { %v381_v53 = vrot.slane %v380_v52, 1 }
 0x4d3   : > { %v382_v54 = vadd.f32 %v381_v53, %v380_v52 }
 0x4d5   : > { %v384_v55 = vmax.f32 %v382_v54, 1e-24 }
 0x4d7   : > { %567 = vrsqrt.f32 %v384_v55 }
 0x4e1   : > { %v568_v57 = vpop.eup %567 }
 0x4e2   : > { %v386_v58 = vmul.f32 %v568_v57, %v566_v56 }
 0x4e4   : > { %v387_v59 = vmul.f32 %v386_v58, %v369_v39 }
 0x4e6   : > { %v388_v60 = vpack.c.bf16 %v387_v59, %v387_v59 }
 0x4e8   : > { %390 = vst.msk [vmem:[%s212_s25] sm:$0xf] %vm389_vm4, %v388_v60 }
 0x4e9   : > { %612 = shalt.err (!%p609_p4)
}
 0x4ea   : > { %s613_s7 = scalar_lea.hbm %s830_s6, 64  ;;  %s617_s11 = scalar_lea.hbm %s878_s4, 128 }
 0x4eb   : > { %p614_p5 = scmp.ne.s32.totalorder %s830_s6, %s613_s7  ;;  %p618_p0 = scmp.lt.u32.totalorder %s830_s6, %s878_s4 }
 0x4ec   : > { %p619_p1 = scmp.lt.u32.totalorder %s617_s11, %s613_s7  ;;  %p621_p6 = scmp.lt.u32.totalorder %s613_s7, %s830_s6 }
 0x4ed   : > { %p615_p8 = pnand %p614_p5, %p887_p11 }
 0x4ee   : > { %p620_p3 = por %p619_p1, %p618_p0 }
 0x4ef   : > { %p616_p9 = pneg %p615_p8 }
 0x4f0   : > { %p622_p12 = por %p621_p6, %p620_p3 }
 0x4f2   : > { %p623_p13 = pnand %p622_p12, %p616_p9 }
 0x4f4   : > { %626 = shalt.err (!%p623_p13)
}
 0x4f5   : > { %509 = dma.vmem_to_hbm [thread:$0]  (%p887_p11), %s832_s29, 64, %s830_s6, %s392_s9  }
 0x4f6 PF: > { %s417_s22 = sand.u32 1, %s653_s15   ;;  %p888_p7 = scmp.ne.s32.totalorder %s883_s28, 0 }
 0x4f7   : > { %p889_p10 = scmp.ge.s32.totalorder %s665_s18, 2  ;;  %s418_s23 = scalar_lea.sflag [#allocation4], %s417_s22 }
 0x4f9   : > { %p516_p2 = pnand %p889_p10, %p888_p7 }
 0x4fb   : > { %648 = dma.done.wait (!%p516_p2), %s418_s23, 64  }
 0x4fc   : > { %650 = vsyncadd (!%p516_p2), %s418_s23, 4294967232  ;;  %p17_p4 = scmp.ge.s32.totalorder %s721_s21, 4   ;;  %s890_s15 = smov %s657_s16 }
 0x4fd   : > { %s891_s16 = smov %s661_s17  ;;  %s892_s17 = smov %s733_s24 }
 0x4fe   : > { %s893_s18 = smov %s721_s21  ;;  %19 = sbr.rel (!%p17_p4) target bundleno = 5 (0x5), region = 81 }
 0x505   :  { %423 = vsyncpa [#allocation3], 1 }
 0x506   :  { %425 = vsyncpa [#allocation3 + $0x1], 1 }
 0x507   :  { %426 = vsyncpa [#allocation4], 1 }
 0x508   :  { %428 = vsyncpa [#allocation4 + $0x1], 1 }

</bundles_post_ra>
